<compile_context>
chip_gen: v6e
topology: v6e:2x2x1
jax: 0.10.0
libtpu: 0.0.40
codegen_flags: <defaults>
</compile_context>

<pallas_src>
import jax
import jax.numpy as jnp
from jax.experimental import pallas as pl
from jax.experimental.pallas import tpu as pltpu


def _mlp_kernel(x_ref, w1_ref, b1_ref, w2_ref, b2_ref, w3t_ref, b3_ref, o_ref):
    # x tile arrives as f32 straight from HBM; cast to bf16 in-register so layer 1
    # runs a single-pass bf16 MXU matmul with f32 accumulation.
    x = x_ref[...].astype(jnp.bfloat16)
    h1 = jnp.dot(x, w1_ref[...], preferred_element_type=jnp.float32) + b1_ref[...]
    h1 = jnp.maximum(h1, 0.0)
    # Layer 2: small f32 matmul (64x32), hidden under the x DMA.
    h2 = jnp.dot(h1, w2_ref[...], preferred_element_type=jnp.float32) + b2_ref[...]
    h2 = jnp.maximum(h2, 0.0)
    # Layer 3 (out_features=1): an N=1 matmul wastes an MXU pass, so use a VPU
    # multiply + cross-lane (XLU) reduce.  w3t is (1, 32).  Store lane-dense.
    y = jnp.sum(h2 * w3t_ref[...], axis=-1)            # (TB,)
    o_ref[...] = y.reshape(1, 1, -1) + b3_ref[...]     # (1, 1, TB) lane-dense row


def _vmem_capacity_bytes():
    """Physical VMEM per TensorCore (128 MiB on v5e/v6e, 64 MiB on v7x)."""
    try:
        cap = int(pltpu.get_tpu_info().vmem_capacity_bytes)
        if cap > 0:
            return cap
    except Exception:
        pass
    return 64 * 1024 * 1024  # conservative fallback (v7x per-TC)


def _pick_batch_tile(batch, d_in, x_budget_bytes):
    """Largest batch tile (multiple of 128) whose double-buffered f32 x tiles plus
    lane-dense output buffers fit the budget, capped so that batches large enough to
    split still produce >= 2 grid steps (so "parallel" feeds both v7x TensorCores)."""
    d_pad = ((d_in + 127) // 128) * 128
    # per row: 2 x-buffers (f32, lane-padded to d_pad) + 2 output buffers
    # ((1, TB) f32 rows, sublane-padded 1 -> 8).
    per_row = 2 * d_pad * 4 + 2 * 8 * 4
    fixed = d_pad * 64 * 2 + 256 * 1024          # resident bf16 w1 + slack for small blocks
    tb = max(128, (x_budget_bytes - fixed) // per_row)
    half = -(-max(batch, 1) // 2)                # ceil(batch / 2)
    cap = max(128, ((half + 127) // 128) * 128)  # >= 2 tiles whenever the batch allows
    tb = min(tb, cap)
    return max(128, (tb // 128) * 128)


def sales_predictor_forward(x, params):
    """x: (B, ...) float32; params: dict of w1,b1,w2,b2,w3,b3 (weights stored (in, out))."""
    b = x.shape[0]
    x2d = x.reshape(b, -1)                       # nn.Flatten (pure layout plumbing)
    d_in = x2d.shape[1]
    assert params["w1"].shape[0] == d_in

    # Weights are tiny: a one-time bf16 cast of w1 (MXU-native) is free and halves its
    # resident VMEM footprint.  Everything else stays f32; x stays f32 in HBM.
    w1 = params["w1"].astype(jnp.bfloat16)
    b1, w2, b2 = params["b1"], params["w2"], params["b2"]
    w3t = params["w3"].reshape(1, -1)            # (32, 1) -> (1, 32) for the VPU reduce
    b3 = params["b3"]

    vmem_cap = _vmem_capacity_bytes()
    vmem_limit = (vmem_cap * 3) // 4             # ~96 MiB on v5e/v6e, ~48 MiB on v7x
    x_budget = (vmem_cap * 3) // 8               # ~48 MiB on v5e/v6e, ~24 MiB on v7x

    tb = _pick_batch_tile(b, d_in, x_budget)
    n_tiles = pl.cdiv(b, tb)
    b_pad = n_tiles * tb                         # last (ragged) tile runs past B; those
                                                 # rows are independent and sliced off below

    flops = 2 * b_pad * d_in * 64 + 2 * b_pad * 64 * 32 + 2 * b_pad * 32
    bytes_accessed = (
        x2d.size * 4 + w1.size * 2
        + 4 * (b1.size + w2.size + b2.size + w3t.size + b3.size + b_pad)
    )

    # Weights/biases: whole array as one block, same block every grid step
    # (stays VMEM-resident, no re-DMA per tile).
    def resident(shape):
        return pl.BlockSpec(shape, lambda i, _n=len(shape): (0,) * _n)

    out = pl.pallas_call(
        _mlp_kernel,
        out_shape=jax.ShapeDtypeStruct((n_tiles, 1, tb), jnp.float32),
        grid_spec=pltpu.PrefetchScalarGridSpec(
            num_scalar_prefetch=0,
            grid=(n_tiles,),                               # batch tiles, pipelined
            in_specs=[
                pl.BlockSpec((tb, d_in), lambda i: (i, 0)),  # f32 x tile (double-buffered)
                resident(w1.shape),    # (D, 64) bf16
                resident(b1.shape),    # (1, 64)
                resident(w2.shape),    # (64, 32)
                resident(b2.shape),    # (1, 32)
                resident(w3t.shape),   # (1, 32)
                resident(b3.shape),    # (1, 1)
            ],
            out_specs=pl.BlockSpec((1, 1, tb), lambda i: (i, 0, 0)),  # lane-dense row
        ),
        compiler_params=pltpu.CompilerParams(
            dimension_semantics=("parallel",),             # megacore split on v7x
            vmem_limit_bytes=int(vmem_limit),
        ),
        cost_estimate=pl.CostEstimate(
            flops=int(flops), transcendentals=0, bytes_accessed=int(bytes_accessed)
        ),
    )(x2d, w1, b1, w2, b2, w3t, b3)

    return out.reshape(-1)[:b].reshape(b, 1)


def init_params(key, input_dim):
    """Deterministic init mimicking PyTorch nn.Linear default (U(-1/sqrt(fan_in), +))."""
    dims = [(input_dim, 64), (64, 32), (32, 1)]
    params = {}
    for i, (fan_in, fan_out) in enumerate(dims, start=1):
        key, kw, kb = jax.random.split(key, 3)
        bound = 1.0 / jnp.sqrt(fan_in)
        # stored as (in_features, out_features) so the kernel does x @ W
        params[f"w{i}"] = jax.random.uniform(
            kw, (fan_in, fan_out), jnp.float32, -bound, bound
        )
        params[f"b{i}"] = jax.random.uniform(
            kb, (1, fan_out), jnp.float32, -bound, bound
        )
    return params


if __name__ == "__main__":
    key = jax.random.PRNGKey(0)
    k_x, k_p = jax.random.split(key)

    # Small input consistent with the module: (B, C, H, W) = (2, 4, 4, 2)
    # -> flatten -> (2, 32), so input_dim = 32.
    x = jax.random.normal(k_x, (2, 4, 4, 2), dtype=jnp.float32)
    input_dim = 4 * 4 * 2
    params = init_params(k_p, input_dim)

    out = jax.block_until_ready(sales_predictor_forward(x, params))

    # Pure-JAX reference: layer 1 uses the same bf16-rounded x/w1 the kernel feeds the
    # MXU (accumulation stays f32); layers 2/3 are f32, like the kernel.
    x2d_ref = x.reshape(x.shape[0], -1).astype(jnp.bfloat16).astype(jnp.float32)
    w1_ref = params["w1"].astype(jnp.bfloat16).astype(jnp.float32)
    h1 = jnp.maximum(x2d_ref @ w1_ref + params["b1"], 0.0)
    h2 = jnp.maximum(h1 @ params["w2"] + params["b2"], 0.0)
    ref = h2 @ params["w3"] + params["b3"]

    assert out.shape == (2, 1)
    assert jnp.allclose(out, ref, atol=1e-3, rtol=1e-3), (out, ref)

    print("KERNEL_OK")
</pallas_src>

<mosaic_0001>
module attributes {stable_mosaic.version = 11 : i64} {
  func.func @_mlp_kernel(%arg0: i32, %arg1: memref<128x32xf32, #tpu.memory_space<vmem>>, %arg2: memref<32x64xbf16, #tpu.memory_space<vmem>>, %arg3: memref<1x64xf32, #tpu.memory_space<vmem>>, %arg4: memref<64x32xf32, #tpu.memory_space<vmem>>, %arg5: memref<1x32xf32, #tpu.memory_space<vmem>>, %arg6: memref<1x32xf32, #tpu.memory_space<vmem>>, %arg7: memref<1x1xf32, #tpu.memory_space<vmem>>, %arg8: memref<1x1x128xf32, #tpu.memory_space<vmem>>) attributes {dimension_semantics = [#tpu.dimension_semantics<parallel>], iteration_bounds = array<i64: 1>, scalar_prefetch = 0 : i64, scratch_operands = 0 : i64, tpu.core_type = #tpu.core_type<tc>, window_params = [{transform_indices = @transform_0, window_bounds = array<i64: 128, 32>}, {pipeline_mode = #tpu.pipeline_mode<synchronous>, transform_indices = @transform_1, window_bounds = array<i64: 32, 64>}, {pipeline_mode = #tpu.pipeline_mode<synchronous>, transform_indices = @transform_2, window_bounds = array<i64: 1, 64>}, {pipeline_mode = #tpu.pipeline_mode<synchronous>, transform_indices = @transform_3, window_bounds = array<i64: 64, 32>}, {pipeline_mode = #tpu.pipeline_mode<synchronous>, transform_indices = @transform_4, window_bounds = array<i64: 1, 32>}, {pipeline_mode = #tpu.pipeline_mode<synchronous>, transform_indices = @transform_5, window_bounds = array<i64: 1, 32>}, {pipeline_mode = #tpu.pipeline_mode<synchronous>, transform_indices = @transform_6, window_bounds = array<i64: 1, 1>}, {transform_indices = @transform_7, window_bounds = array<i64: 1, 1, 128>}]} {
    %c0 = arith.constant 0 : index
    %c0_0 = arith.constant 0 : index
    %0 = vector.load %arg1[%c0, %c0_0] : memref<128x32xf32, #tpu.memory_space<vmem>>, vector<128x32xf32>
    %1 = arith.truncf %0 : vector<128x32xf32> to vector<128x32xbf16>
    %c0_1 = arith.constant 0 : index
    %c0_2 = arith.constant 0 : index
    %2 = vector.load %arg2[%c0_1, %c0_2] : memref<32x64xbf16, #tpu.memory_space<vmem>>, vector<32x64xbf16>
    %cst = arith.constant dense<0.000000e+00> : vector<128x64xf32>
    %3 = tpu.matmul %1, %2, %cst {dimension_numbers = #tpu.dot_dimension_numbers<[1], [0], [0], [1], [0, 0, 1, 1], [], []>} : vector<128x32xbf16>, vector<32x64xbf16>, vector<128x64xf32> -> vector<128x64xf32>
    %c0_3 = arith.constant 0 : index
    %c0_4 = arith.constant 0 : index
    %4 = vector.load %arg3[%c0_3, %c0_4] : memref<1x64xf32, #tpu.memory_space<vmem>>, vector<1x64xf32>
    %5 = vector.broadcast %4 : vector<1x64xf32> to vector<128x64xf32>
    %6 = arith.addf %3, %5 : vector<128x64xf32>
    %cst_5 = arith.constant 0.000000e+00 : f32
    %7 = vector.broadcast %cst_5 : f32 to vector<128x64xf32>
    %8 = arith.maximumf %6, %7 : vector<128x64xf32>
    %c0_6 = arith.constant 0 : index
    %c0_7 = arith.constant 0 : index
    %9 = vector.load %arg4[%c0_6, %c0_7] : memref<64x32xf32, #tpu.memory_space<vmem>>, vector<64x32xf32>
    %cst_8 = arith.constant dense<0.000000e+00> : vector<128x32xf32>
    %10 = tpu.matmul %8, %9, %cst_8 {dimension_numbers = #tpu.dot_dimension_numbers<[1], [0], [0], [1], [0, 0, 1, 1], [], []>} : vector<128x64xf32>, vector<64x32xf32>, vector<128x32xf32> -> vector<128x32xf32>
    %c0_9 = arith.constant 0 : index
    %c0_10 = arith.constant 0 : index
    %11 = vector.load %arg5[%c0_9, %c0_10] : memref<1x32xf32, #tpu.memory_space<vmem>>, vector<1x32xf32>
    %12 = vector.broadcast %11 : vector<1x32xf32> to vector<128x32xf32>
    %13 = arith.addf %10, %12 : vector<128x32xf32>
    %cst_11 = arith.constant 0.000000e+00 : f32
    %14 = vector.broadcast %cst_11 : f32 to vector<128x32xf32>
    %15 = arith.maximumf %13, %14 : vector<128x32xf32>
    %c0_12 = arith.constant 0 : index
    %c0_13 = arith.constant 0 : index
    %16 = vector.load %arg6[%c0_12, %c0_13] : memref<1x32xf32, #tpu.memory_space<vmem>>, vector<1x32xf32>
    %17 = vector.broadcast %16 : vector<1x32xf32> to vector<128x32xf32>
    %18 = arith.mulf %15, %17 : vector<128x32xf32>
    %cst_14 = arith.constant dense<0.000000e+00> : vector<128xf32>
    %19 = vector.multi_reduction <add>, %18, %cst_14 [1] : vector<128x32xf32> to vector<128xf32>
    %20 = vector.shape_cast %19 : vector<128xf32> to vector<1x1x128xf32>
    %c0_15 = arith.constant 0 : index
    %c0_16 = arith.constant 0 : index
    %21 = vector.load %arg7[%c0_15, %c0_16] : memref<1x1xf32, #tpu.memory_space<vmem>>, vector<1x1xf32>
    %22 = vector.shape_cast %21 : vector<1x1xf32> to vector<1x1x1xf32>
    %23 = vector.broadcast %22 : vector<1x1x1xf32> to vector<1x1x128xf32>
    %24 = arith.addf %20, %23 : vector<1x1x128xf32>
    %c0_17 = arith.constant 0 : index
    %c0_18 = arith.constant 0 : index
    %c0_19 = arith.constant 0 : index
    %25 = vector.load %arg8[%c0_17, %c0_18, %c0_19] : memref<1x1x128xf32, #tpu.memory_space<vmem>>, vector<1x1x128xf32>
    tpu.vector_store %arg8[%c0_17, %c0_18, %c0_19], %24 {strides = array<i32>} : memref<1x1x128xf32, #tpu.memory_space<vmem>>, vector<1x1x128xf32>,
    return
  }
  func.func @transform_0(%arg0: i32) -> (i32, i32) {
    %c0_i32 = arith.constant 0 : i32
    %c0_i32_0 = arith.constant 0 : i32
    return %arg0, %c0_i32 : i32, i32
  }
  func.func @transform_1(%arg0: i32) -> (i32, i32) {
    %c0_i32 = arith.constant 0 : i32
    %c0_i32_0 = arith.constant 0 : i32
    %c0_i32_1 = arith.constant 0 : i32
    return %c0_i32, %c0_i32_0 : i32, i32
  }
  func.func @transform_2(%arg0: i32) -> (i32, i32) {
    %c0_i32 = arith.constant 0 : i32
    %c0_i32_0 = arith.constant 0 : i32
    %c0_i32_1 = arith.constant 0 : i32
    return %c0_i32, %c0_i32_0 : i32, i32
  }
  func.func @transform_3(%arg0: i32) -> (i32, i32) {
    %c0_i32 = arith.constant 0 : i32
    %c0_i32_0 = arith.constant 0 : i32
    %c0_i32_1 = arith.constant 0 : i32
    return %c0_i32, %c0_i32_0 : i32, i32
  }
  func.func @transform_4(%arg0: i32) -> (i32, i32) {
    %c0_i32 = arith.constant 0 : i32
    %c0_i32_0 = arith.constant 0 : i32
    %c0_i32_1 = arith.constant 0 : i32
    return %c0_i32, %c0_i32_0 : i32, i32
  }
  func.func @transform_5(%arg0: i32) -> (i32, i32) {
    %c0_i32 = arith.constant 0 : i32
    %c0_i32_0 = arith.constant 0 : i32
    %c0_i32_1 = arith.constant 0 : i32
    return %c0_i32, %c0_i32_0 : i32, i32
  }
  func.func @transform_6(%arg0: i32) -> (i32, i32) {
    %c0_i32 = arith.constant 0 : i32
    %c0_i32_0 = arith.constant 0 : i32
    %c0_i32_1 = arith.constant 0 : i32
    return %c0_i32, %c0_i32_0 : i32, i32
  }
  func.func @transform_7(%arg0: i32) -> (i32, i32, i32) {
    %c0_i32 = arith.constant 0 : i32
    %c0_i32_0 = arith.constant 0 : i32
    %c0_i32_1 = arith.constant 0 : i32
    return %arg0, %c0_i32, %c0_i32_0 : i32, i32, i32
  }
}

</mosaic_0001>

<bundles_post_ra>
// kernel: tpu_custom_call.1
= control target key start
LH: loop header
LB: loop body
LE: loop exit
PB: predicated region body
PF: predicated region fallthrough
CT: control target
= control target key end

     0   :  { %s1118_s0 = inlined_call_operand.vmem [shape: f32[2,32], index: 0, kind: input, shape index: {}]   ;;  %s1119_s1 = inlined_call_operand.vmem [shape: bf16[32,64], index: 1, kind: input, shape index: {}]   ;;  %s1120_s2 = inlined_call_operand.vmem [shape: f32[1,64], index: 2, kind: input, shape index: {}]   ;;  %s1121_s3 = inlined_call_operand.vmem [shape: f32[64,32], index: 3, kind: input, shape index: {}]   ;;  %s1122_s4 = inlined_call_operand.vmem [shape: f32[1,32], index: 4, kind: input, shape index: {}]   ;;  %s1123_s5 = inlined_call_operand.vmem [shape: f32[1,32], index: 5, kind: input, shape index: {}]   ;;  %s1124_s6 = inlined_call_operand.<no memory space> [shape: f32[1,1], index: 6, kind: input, shape index: {}]   ;;  %s1125_s7 = inlined_call_operand.hbm [shape: f32[1,1,128], index: 7, kind: output, shape index: {}]  }
   0x1   :  { %v12_v0 = vstv %s1124_s6 }
   0x2   :  { %13 = vst [vmem:[#allocation2] sm:$0x1] %v12_v0 }
   0x3   :  { %v823_v1 = vld [vmem:[%s1119_s1 + $0x8] sm:$0xff]   ;;  %v824_v2 = vld [vmem:[%s1119_s1] sm:$0xff]   ;;  %vm77_vm0 = vcmask 261120   ;;  %v32_v6 = vld [vmem:[%s1118_s0 + $0x10] sm:$0xff] }
   0x4   :  { %743 = vmatprep.subr.bf16.mxu0 %v823_v1  ;;  %v30_v3 = vld [vmem:[%s1118_s0] sm:$0xff]  ;;  %v31_v4 = vld [vmem:[%s1118_s0 + $0x8] sm:$0xff]  ;;  %v33_v7 = vld [vmem:[%s1118_s0 + $0x18] sm:$0xff] }
   0x5   :  { %744 = vmatpush3.bf16.msra.mxu0 %v823_v1  ;;  %v46_v5 = vpack.c.bf16 %v31_v4, %v30_v3  ;;  %v34_v8 = vld [vmem:[%s1118_s0 + $0x20] sm:$0xff]  ;;  %v35_v9 = vld [vmem:[%s1118_s0 + $0x28] sm:$0xff]  ;;  %v47_v10 = vpack.c.bf16 %v33_v7, %v32_v6  ;;  %v222_v12 = vld [vmem:[%s1121_s3 + $0x38] sm:$0xff] }
   0x6   :  { %745 = vmatprep.subr.bf16.mxu0 %v824_v2  ;;  %v48_v11 = vpack.c.bf16 %v35_v9, %v34_v8  ;;  %v221_v13 = vld [vmem:[%s1121_s3 + $0x30] sm:$0xff]  ;;  %803 = vmatprep.subr.mxu1 %v222_v12 }
   0x7   :  { %747 = vmatprep.mubr.msk.bf16.mxu0 %vm77_vm0, %v46_v5 }
   0x9   :  { %746 = vmatpush3.bf16.msra.mxu0 %v824_v2 }
   0xa   :  { %763 = vmatprep.subr.mxu0 %v222_v12 }
   0xb   :  { %14 = vsyncpa [#allocation4], 0  ;;  %811 = vmatpush3.msra.mxu1 %v222_v12  ;;  %v220_v14 = vld [vmem:[%s1121_s3 + $0x28] sm:$0xff]  ;;  %v36_v15 = vld [vmem:[%s1118_s0 + $0x30] sm:$0xff]  ;;  %vm230_vm1 = vcmask 523264   ;;  %vm564_vm2 = vcmask 130112  }
   0xc   :  { %748 = vmatmul.mubr.msk.bf16.vlgmr.msra.gmra.mxu0 %vm77_vm0, %v47_v10  ;;  %804 = vmatprep.subr.mxu1 %v221_v13  ;;  %v37_v16 = vld [vmem:[%s1118_s0 + $0x38] sm:$0xff]  ;;  %v38_v17 = vld [vmem:[%s1118_s0 + $0x40] sm:$0xff]  ;;  %v39_v18 = vld [vmem:[%s1118_s0 + $0x48] sm:$0xff]  ;;  %vm571_vm3 = vcmask 195712   ;;  %vm578_vm4 = vcmask 261312   ;;  %vm585_vm5 = vcmask 326912  }
   0xd   :  { %751 = vmatprep.mubr.msk.bf16.mxu0 %vm77_vm0, %v48_v11  ;;  %764 = vmatpush3.msra.mxu0 %v222_v12  ;;  %v219_v19 = vld [vmem:[%s1121_s3 + $0x20] sm:$0xff]  ;;  %v49_v20 = vpack.c.bf16 %v37_v16, %v36_v15  ;;  %v50_v21 = vpack.c.bf16 %v39_v18, %v38_v17  ;;  %v40_v22 = vld [vmem:[%s1118_s0 + $0x50] sm:$0xff]  ;;  %v41_v23 = vld [vmem:[%s1118_s0 + $0x58] sm:$0xff]  ;;  %vm592_vm6 = vcmask 392512   ;;  %vm599_vm7 = vcmask 458112  }
   0xe   :  { %812 = vmatpush3.msra.mxu1 %v221_v13  ;;  %765 = vmatprep.subr.mxu0 %v221_v13  ;;  %v42_v24 = vld [vmem:[%s1118_s0 + $0x60] sm:$0xff]  ;;  %v43_v25 = vld [vmem:[%s1118_s0 + $0x68] sm:$0xff]  ;;  %v51_v26 = vpack.c.bf16 %v41_v23, %v40_v22  ;;  %v44_v28 = vld [vmem:[%s1118_s0 + $0x70] sm:$0xff]  ;;  %vm606_vm8 = vcmask 523712   ;;  %vm613_vm9 = vcmask 589312   ;;  %vm620_vm10 = vcmask 654912  }
   0xf   :  { %805 = vmatprep.subr.mxu1 %v220_v14  ;;  %766 = vmatpush3.msra.mxu0 %v221_v13  ;;  %v52_v27 = vpack.c.bf16 %v43_v25, %v42_v24  ;;  %v45_v29 = vld [vmem:[%s1118_s0 + $0x78] sm:$0xff]  ;;  %v217_v32 = vld [vmem:[%s1121_s3 + $0x10] sm:$0xff]  ;;  %v216_v33 = vld [vmem:[%s1121_s3 + $0x8] sm:$0xff]  ;;  %vm627_vm11 = vcmask 720512   ;;  %vm634_vm12 = vcmask 786112   ;;  %vm641_vm13 = vcmask 851712  }
  0x10   :  { %813 = vmatpush3.msra.mxu1 %v220_v14  ;;  %767 = vmatprep.subr.mxu0 %v220_v14  ;;  %v53_v30 = vpack.c.bf16 %v45_v29, %v44_v28  ;;  %v218_v31 = vld [vmem:[%s1121_s3 + $0x18] sm:$0xff]  ;;  %v215_v34 = vld [vmem:[%s1121_s3] sm:$0xff]  ;;  %vm648_vm14 = vcmask 917312   ;;  %vm655_vm15 = vcmask 982912  }
  0x11   :  { %806 = vmatprep.subr.mxu1 %v219_v19  ;;  %768 = vmatpush3.msra.mxu0 %v220_v14  ;;  %v680_v35 = vld [vmem:[%s1120_s2] ss:$0 sm:$0xff] }
  0x12   :  { %814 = vmatpush3.msra.mxu1 %v219_v19  ;;  %769 = vmatprep.subr.mxu0 %v219_v19 }
  0x13   :  { %770 = vmatpush3.msra.mxu0 %v219_v19  ;;  %807 = vmatprep.subr.mxu1 %v218_v31 }
  0x14   :  { %752 = vmatmul.mubr.msk.bf16.gmra.mxu0 %vm77_vm0, %v49_v20  ;;  %771 = vmatprep.subr.mxu0 %v218_v31  ;;  %v847_v20 = vmov 0  }
  0x15   :  { %755 = vmatprep.mubr.msk.bf16.mxu0 %vm77_vm0, %v50_v21  ;;  %815 = vmatpush3.msra.mxu1 %v218_v31  ;;  %v1000_v21 = vld [vmem:[%s1122_s4] ss:$0 sm:$0xff]  ;;  %s848_s4 = smov [#allocation3]  }
  0x16   :  { %772 = vmatpush3.msra.mxu0 %v218_v31  ;;  %808 = vmatprep.subr.mxu1 %v217_v32 }
  0x17   :  { %773 = vmatprep.subr.mxu0 %v217_v32  ;;  %816 = vmatpush3.msra.mxu1 %v217_v32 }
  0x18   :  { %774 = vmatpush3.msra.mxu0 %v217_v32  ;;  %809 = vmatprep.subr.mxu1 %v216_v33 }
  0x19   :  { %775 = vmatprep.subr.mxu0 %v216_v33  ;;  %817 = vmatpush3.msra.mxu1 %v216_v33 }
  0x1a   :  { %776 = vmatpush3.msra.mxu0 %v216_v33  ;;  %810 = vmatprep.subr.mxu1 %v215_v34 }
  0x1b   :  { %777 = vmatprep.subr.mxu0 %v215_v34  ;;  %818 = vmatpush3.msra.mxu1 %v215_v34 }
  0x1c   :  { %756 = vmatmul.mubr.msk.bf16.gmra.mxu0 %vm77_vm0, %v51_v26  ;;  %821 = vset.pattern.permute.xlu1 %v847_v20  ;;  %v1006_v26 = vld [vmem:[%s1123_s5] ss:$0 sm:$0xff]  ;;  %s672_s5 = sshll.u32 %s848_s4, 4  ;;  %s673_s5 = int_to_ptr.vmem [resolvable:$true] %s672_s5 }
  0x1d   :  { %759 = vmatprep.mubr.msk.bf16.mxu0 %vm77_vm0, %v52_v27  ;;  %778 = vmatpush3.msra.mxu0 %v215_v34  ;;  %s825_s8 = scalar_lea.vmem %s673_s5, 16  ;;  %s829_s9 = scalar_lea.vmem %s673_s5, 32 }
  0x1e   :  { %822 = vset.pattern.permute.xlu0 %v847_v20  ;;  %p826_p0 = scmp.ne.s32.totalorder %s673_s5, %s825_s8  ;;  %p830_p1 = scmp.lt.s32.totalorder %s673_s5, %s673_s5 }
  0x1f   :  { %p831_p2 = scmp.lt.s32.totalorder %s829_s9, %s825_s8 }
  0x21   :  { %p832_p3 = por %p831_p2, %p830_p1 }
  0x23   :  { %p833_p4 = pnand %p832_p3, %p826_p0 }
  0x24   :  { %760 = vmatmul.mubr.msk.bf16.gmra.mxu0 %vm77_vm0, %v53_v30 }
  0xcc   :  { %v749_v36 = vpop.f32.mrf.mxu0 }
  0xcd   :  { %v145_v37 = vadd.f32 %v749_v36, %v680_v35 }
  0xce   :  { %v136_v38 = vpop.f32.mrf.mxu0 }
  0xcf   :  { %v201_v39 = vmax.f32 %v145_v37, 0.0  ;;  %v137_v40 = vadd.f32 %v680_v35, %v136_v38 }
  0xd0   :  { %v750_v41 = vpop.f32.mrf.mxu0 }
  0xd1   :  { %v199_v42 = vmax.f32 %v137_v40, 0.0  ;;  %v148_v43 = vadd.f32 %v750_v41, %v680_v35  ;;  %782 = vmatprep.mubr.msk.f32.mxu1 %vm230_vm1, %v201_v39 }
  0xd2   :  { %v139_v44 = vpop.f32.mrf.mxu0 }
  0xd3   :  { %v202_v45 = vmax.f32 %v148_v43, 0.0  ;;  %v140_v46 = vadd.f32 %v680_v35, %v139_v44  ;;  %779 = vmatprep.mubr.msk.f32.mxu0 %vm230_vm1, %v199_v42 }
  0xd4   :  { %v753_v47 = vpop.f32.mrf.mxu0 }
  0xd5   :  { %v200_v48 = vmax.f32 %v140_v46, 0.0  ;;  %783 = vmatmul.mubr.msk.f32.vlgmr.msra.gmra.mxu1 %vm230_vm1, %v202_v45  ;;  %v161_v53 = vadd.f32 %v753_v47, %v680_v35 }
  0xd6   :  { %v152_v49 = vpop.f32.mrf.mxu0 }
  0xd7   :  { %v153_v50 = vadd.f32 %v680_v35, %v152_v49  ;;  %780 = vmatmul.mubr.msk.f32.vlgmr.msra.gmra.mxu0 %vm230_vm1, %v200_v48  ;;  %v205_v59 = vmax.f32 %v161_v53, 0.0 }
  0xd8   :  { %v754_v51 = vpop.f32.mrf.mxu0 }
  0xd9   :  { %v203_v52 = vmax.f32 %v153_v50, 0.0  ;;  %v164_v57 = vadd.f32 %v754_v51, %v680_v35 }
  0xda   :  { %v155_v54 = vpop.f32.mrf.mxu0 }
  0xdb   :  { %v156_v55 = vadd.f32 %v680_v35, %v155_v54  ;;  %785 = vmatprep.mubr.msk.f32.mxu1 %vm230_vm1, %v203_v52  ;;  %v206_v0 = vmax.f32 %v164_v57, 0.0 }
  0xdc   :  { %v757_v56 = vpop.f32.mrf.mxu0 }
  0xdd   :  { %v204_v58 = vmax.f32 %v156_v55, 0.0  ;;  %v177_v62 = vadd.f32 %v757_v56, %v680_v35 }
  0xde   :  { %v168_v60 = vpop.f32.mrf.mxu0 }
  0xdf   :  { %786 = vmatmul.mubr.msk.f32.gmra.mxu1 %vm230_vm1, %v204_v58  ;;  %v169_v61 = vadd.f32 %v680_v35, %v168_v60  ;;  %v209_v5 = vmax.f32 %v177_v62, 0.0 }
  0xe0   :  { %788 = vmatprep.mubr.msk.f32.mxu1 %vm230_vm1, %v205_v59  ;;  %v758_v63 = vpop.f32.mrf.mxu0 }
  0xe1   :  { %v207_v1 = vmax.f32 %v169_v61, 0.0  ;;  %v180_v3 = vadd.f32 %v758_v63, %v680_v35 }
  0xe2   :  { %v171_v2 = vpop.f32.mrf.mxu0 }
  0xe3   :  { %789 = vmatmul.mubr.msk.f32.gmra.mxu1 %vm230_vm1, %v206_v0  ;;  %v172_v4 = vadd.f32 %v680_v35, %v171_v2  ;;  %v210_v9 = vmax.f32 %v180_v3, 0.0 }
  0xe4   :  { %791 = vmatprep.mubr.msk.f32.mxu1 %vm230_vm1, %v207_v1  ;;  %v761_v6 = vpop.f32.mrf.mxu0 }
  0xe5   :  { %v208_v7 = vmax.f32 %v172_v4, 0.0  ;;  %v193_v11 = vadd.f32 %v761_v6, %v680_v35 }
  0xe6   :  { %v184_v8 = vpop.f32.mrf.mxu0 }
  0xe7   :  { %792 = vmatmul.mubr.msk.f32.gmra.mxu1 %vm230_vm1, %v208_v7  ;;  %v185_v10 = vadd.f32 %v680_v35, %v184_v8  ;;  %v213_v17 = vmax.f32 %v193_v11, 0.0 }
  0xe8   :  { %v762_v12 = vpop.f32.mrf.mxu0  ;;  %794 = vmatprep.mubr.msk.f32.mxu1 %vm230_vm1, %v209_v5 }
  0xe9   :  { %v211_v13 = vmax.f32 %v185_v10, 0.0  ;;  %v196_v15 = vadd.f32 %v762_v12, %v680_v35 }
  0xea   :  { %v187_v14 = vpop.f32.mrf.mxu0 }
  0xeb   :  { %795 = vmatmul.mubr.msk.f32.gmra.mxu1 %vm230_vm1, %v210_v9  ;;  %v188_v16 = vadd.f32 %v680_v35, %v187_v14  ;;  %v214_v19 = vmax.f32 %v196_v15, 0.0 }
  0xec   :  { %797 = vmatprep.mubr.msk.f32.mxu1 %vm230_vm1, %v211_v13 }
  0xed   :  { %v212_v18 = vmax.f32 %v188_v16, 0.0  ;;  %v511_v16 = vld [vmem:[#allocation2] sm:$0x1] }
  0xef   :  { %798 = vmatmul.mubr.msk.f32.gmra.mxu1 %vm230_vm1, %v212_v18 }
  0xf0   :  { %800 = vmatprep.mubr.msk.f32.mxu1 %vm230_vm1, %v213_v17 }
  0xf3   :  { %801 = vmatmul.mubr.msk.f32.gmra.mxu1 %vm230_vm1, %v214_v19 }
 0x195   :  { %v784_v22 = vpop.f32.mrf.mxu1 }
 0x196   :  { %v361_v23 = vadd.f32 %v784_v22, %v1000_v21 }
 0x197   :  { %v781_v24 = vpop.f32.mrf.mxu0  ;;  %v355_v25 = vpop.f32.mrf.mxu1 }
 0x198   :  { %v427_v27 = vmax.f32 %v361_v23, 0.0  ;;  %v351_v28 = vadd.f32 %v781_v24, %v1000_v21  ;;  %v356_v29 = vadd.f32 %v1000_v21, %v355_v25 }
 0x199   :  { %v345_v30 = vpop.f32.mrf.mxu0 }
 0x19a   :  { %v425_v31 = vmax.f32 %v351_v28, 0.0  ;;  %v426_v32 = vmax.f32 %v356_v29, 0.0  ;;  %v346_v33 = vadd.f32 %v1000_v21, %v345_v30  ;;  %v450_v34 = vmul.f32 %v1006_v26, %v427_v27 }
 0x19c   :  { %v424_v35 = vmax.f32 %v346_v33, 0.0  ;;  %v472_v36 = vsel %vm77_vm0, %v450_v34, 0.0  ;;  %v448_v37 = vmul.f32 %v1006_v26, %v425_v31  ;;  %v449_v38 = vmul.f32 %v1006_v26, %v426_v32 }
 0x19d   :  { %473 = vadd.xlane.f32.xlu1 %v472_v36 }
 0x19e   :  { %v466_v39 = vsel %vm77_vm0, %v448_v37, 0.0  ;;  %v447_v40 = vmul.f32 %v1006_v26, %v424_v35  ;;  %v469_v43 = vsel %vm77_vm0, %v449_v38, 0.0 }
 0x19f   :  { %v787_v41 = vpop.f32.mrf.mxu1  ;;  %467 = vadd.xlane.f32.xlu0 %v466_v39 }
 0x1a0   :  { %v371_v42 = vadd.f32 %v787_v41, %v1000_v21  ;;  %v463_v47 = vsel %vm77_vm0, %v447_v40, 0.0 }
 0x1a1   :  { %470 = vadd.xlane.f32.xlu1 %v469_v43  ;;  %v365_v44 = vpop.f32.mrf.mxu1 }
 0x1a2   :  { %v429_v45 = vmax.f32 %v371_v42, 0.0  ;;  %v366_v46 = vadd.f32 %v1000_v21, %v365_v44 }
 0x1a3   :  { %v790_v48 = vpop.f32.mrf.mxu1  ;;  %464 = vadd.xlane.f32.xlu0 %v463_v47 }
 0x1a4   :  { %v428_v49 = vmax.f32 %v366_v46, 0.0  ;;  %v381_v50 = vadd.f32 %v790_v48, %v1000_v21  ;;  %v452_v51 = vmul.f32 %v1006_v26, %v429_v45  ;;  %v517_v48 = vlaneseq }
 0x1a5   :  { %v375_v52 = vpop.f32.mrf.mxu1 }
 0x1a6   :  { %v431_v53 = vmax.f32 %v381_v50, 0.0  ;;  %v376_v54 = vadd.f32 %v1000_v21, %v375_v52  ;;  %v478_v55 = vsel %vm77_vm0, %v452_v51, 0.0  ;;  %v451_v56 = vmul.f32 %v1006_v26, %v428_v49 }
 0x1a7   :  { %479 = vadd.xlane.f32.xlu1 %v478_v55  ;;  %v793_v57 = vpop.f32.mrf.mxu1  ;;  %v1055_v51 = vshrl.u32 %v517_v48, 7 }
 0x1a8   :  { %v430_v58 = vmax.f32 %v376_v54, 0.0  ;;  %v475_v59 = vsel %vm77_vm0, %v451_v56, 0.0  ;;  %v391_v60 = vadd.f32 %v793_v57, %v1000_v21  ;;  %v454_v61 = vmul.f32 %v1006_v26, %v431_v53 }
 0x1a9   :  { %476 = vadd.xlane.f32.xlu0 %v475_v59  ;;  %v385_v62 = vpop.f32.mrf.mxu1  ;;  %v1060_v53 = vand.u32 127, %v517_v48 }
 0x1aa   :  { %v433_v63 = vmax.f32 %v391_v60, 0.0  ;;  %v386_v0 = vadd.f32 %v1000_v21, %v385_v62  ;;  %v484_v2 = vsel %vm77_vm0, %v454_v61, 0.0  ;;  %v453_v3 = vmul.f32 %v1006_v26, %v430_v58 }
 0x1ab   :  { %v796_v1 = vpop.f32.mrf.mxu1  ;;  %v559_v55 = vadd.s32 4294967288, %v1060_v53  ;;  %v566_v57 = vadd.s32 4294967280, %v1060_v53  ;;  %v557_v60 = vsub.s32 %v1060_v53, %v1055_v51  ;;  %v650_v48 = vadd.s32 4294967184, %v1060_v53 }
 0x1ac   :  { %v432_v5 = vmax.f32 %v386_v0, 0.0  ;;  %v456_v7 = vmul.f32 %v1006_v26, %v433_v63  ;;  %v481_v9 = vsel %vm77_vm0, %v453_v3, 0.0  ;;  %v401_v38 = vadd.f32 %v796_v1, %v1000_v21 }
 0x1ad   :  { %485 = vadd.xlane.f32.xlu0 %v484_v2  ;;  %v395_v4 = vpop.f32.mrf.mxu1  ;;  %v562_v61 = vsub.s32 %v559_v55, %v1055_v51  ;;  %v569_v63 = vsub.s32 %v566_v57, %v1055_v51  ;;  %v573_v3 = vadd.s32 4294967272, %v1060_v53 }
 0x1ae   :  { %v396_v6 = vadd.f32 %v1000_v21, %v395_v4  ;;  %v490_v12 = vsel %vm77_vm0, %v456_v7, 0.0  ;;  %v455_v14 = vmul.f32 %v1006_v26, %v432_v5  ;;  %v435_v39 = vmax.f32 %v401_v38, 0.0 }
 0x1af   :  { %v799_v8 = vpop.f32.mrf.mxu1  ;;  %v580_v5 = vadd.s32 4294967264, %v1060_v53 }
 0x1b0   :  { %v434_v11 = vmax.f32 %v396_v6, 0.0  ;;  %v411_v13 = vadd.f32 %v799_v8, %v1000_v21  ;;  %v487_v18 = vsel %vm77_vm0, %v455_v14, 0.0  ;;  %v458_v40 = vmul.f32 %v1006_v26, %v435_v39 }
 0x1b1   :  { %482 = vadd.xlane.f32.xlu0 %v481_v9  ;;  %v405_v10 = vpop.f32.mrf.mxu1  ;;  %v576_v8 = vsub.s32 %v573_v3, %v1055_v51  ;;  %v583_v14 = vsub.s32 %v580_v5, %v1055_v51 }
 0x1b2   :  { %v437_v17 = vmax.f32 %v411_v13, 0.0  ;;  %v406_v19 = vadd.f32 %v1000_v21, %v405_v10  ;;  %v457_v20 = vmul.f32 %v1006_v26, %v434_v11  ;;  %v496_v41 = vsel %vm77_vm0, %v458_v40, 0.0 }
 0x1b3   :  { %v802_v15 = vpop.f32.mrf.mxu1  ;;  %v587_v10 = vadd.s32 4294967256, %v1060_v53  ;;  %v594_v11 = vadd.s32 4294967248, %v1060_v53  ;;  %v629_v40 = vadd.s32 4294967208, %v1060_v53 }
 0x1b4   :  { %v436_v23 = vmax.f32 %v406_v19, 0.0  ;;  %v493_v24 = vsel %vm77_vm0, %v457_v20, 0.0  ;;  %v460_v27 = vmul.f32 %v1006_v26, %v437_v17  ;;  %v421_v28 = vadd.f32 %v802_v15, %v1000_v21 }
 0x1b5   :  { %491 = vadd.xlane.f32.xlu0 %v490_v12  ;;  %v415_v22 = vpop.f32.mrf.mxu1  ;;  %v597_v20 = vsub.s32 %v594_v11, %v1055_v51 }
 0x1b6   :  { %v416_v25 = vadd.f32 %v1000_v21, %v415_v22  ;;  %v502_v30 = vsel %vm77_vm0, %v460_v27, 0.0  ;;  %v459_v31 = vmul.f32 %v1006_v26, %v436_v23  ;;  %v439_v32 = vmax.f32 %v421_v28, 0.0 }
 0x1b7   :  { %v519_v21 = vsub.s32 0, %v1055_v51  ;;  %v608_v23 = vadd.s32 4294967232, %v1060_v53 }
 0x1b8   :  { %514 = vperm.xlu1 %821, %v511_v16   ;;  %v438_v29 = vmax.f32 %v416_v25, 0.0  ;;  %v499_v33 = vsel %vm77_vm0, %v459_v31, 0.0  ;;  %v462_v36 = vmul.f32 %v1006_v26, %v439_v32  ;;  %v601_v25 = vadd.s32 4294967240, %v1060_v53 }
 0x1b9   :  { %488 = vadd.xlane.f32.xlu0 %v487_v18  ;;  %v590_v18 = vsub.s32 %v587_v10, %v1055_v51  ;;  %v611_v32 = vsub.s32 %v608_v23, %v1055_v51 }
 0x1ba   :  { %v461_v34 = vmul.f32 %v1006_v26, %v438_v29  ;;  %v508_v37 = vsel %vm77_vm0, %v462_v36, 0.0  ;;  %v615_v29 = vadd.s32 4294967224, %v1060_v53 }
 0x1bc   :  { %v505_v35 = vsel %vm77_vm0, %v461_v34, 0.0  ;;  %v604_v34 = vsub.s32 %v601_v25, %v1055_v51  ;;  %v618_v38 = vsub.s32 %v615_v29, %v1055_v51  ;;  %vm662_vm0 = vcmask 1048512  }
 0x1bd   :  { %494 = vadd.xlane.f32.xlu0 %v493_v24 }
 0x1c1   :  { %503 = vadd.xlane.f32.xlu0 %v502_v30  ;;  %v622_v30 = vadd.s32 4294967216, %v1060_v53 }
 0x1c3   :  { %v625_v39 = vsub.s32 %v622_v30, %v1055_v51 }
 0x1c5   :  { %500 = vadd.xlane.f32.xlu0 %v499_v33 }
 0x1c9   :  { %506 = vadd.xlane.f32.xlu0 %v505_v35 }
 0x1cd   :  { %509 = vadd.xlane.f32.xlu0 %v508_v37 }
 0x1dc   :  { %497 = vadd.xlane.f32.xlu1 %v496_v41 }
 0x226   :  { %v474_v45 = vpop.xlane.xlu1 %473 }
 0x228   :  { %v468_v42 = vpop.xlane.xlu0 %467 }
 0x22a   :  { %v471_v47 = vpop.xlane.xlu1 %470 }
 0x22c   :  { %v465_v43 = vpop.xlane.xlu0 %464 }
 0x230   :  { %v480_v50 = vpop.xlane.xlu1 %479 }
 0x232   :  { %v477_v44 = vpop.xlane.xlu0 %476 }
 0x234   :  { %v515_v26 = vpop.permute.xlu1 %514 }
 0x235   :  { %v1062_v54 = vrot.slane %v515_v26, %v519_v21  ;;  %v632_v21 = vsub.s32 %v629_v40, %v1055_v51 }
 0x236   :  { %v486_v46 = vpop.xlane.xlu0 %485 }
 0x237   :  { %v521_v58 = vadd.f32 %v1062_v54, %v465_v43  ;;  %v522_v59 = vadd.f32 %v1062_v54, %v468_v42  ;;  %v523_v62 = vadd.f32 %v1062_v54, %v471_v47  ;;  %v524_v6 = vadd.f32 %v1062_v54, %v474_v45 }
 0x238   :  { %v525_v12 = vadd.f32 %v1062_v54, %v477_v44  ;;  %v526_v16 = vadd.f32 %v1062_v54, %v480_v50  ;;  %v528_v35 = vadd.f32 %v1062_v54, %v486_v46  ;;  %v636_v44 = vadd.s32 4294967200, %v1060_v53 }
 0x239   :  { %v558_v1 = vrot.slane %v521_v58, %v557_v60  ;;  %v563_v2 = vrot.slane %v522_v59, %v562_v61  ;;  %v570_v4 = vrot.slane %v523_v62, %v569_v63  ;;  %v577_v15 = vrot.slane %v524_v6, %v576_v8 }
 0x23a   :  { %v483_v49 = vpop.xlane.xlu0 %482  ;;  %v584_v19 = vrot.slane %v525_v12, %v583_v14  ;;  %v591_v28 = vrot.slane %v526_v16, %v590_v18  ;;  %v605_v45 = vrot.slane %v528_v35, %v604_v34  ;;  %v643_v47 = vadd.s32 4294967192, %v1060_v53 }
 0x23b   :  { %v565_v7 = vsel %vm564_vm2, %v563_v2, %v558_v1  ;;  %v527_v22 = vadd.f32 %v1062_v54, %v483_v49  ;;  %v657_v49 = vadd.s32 4294967176, %v1060_v53  ;;  %v653_v62 = vsub.s32 %v650_v48, %v1055_v51 }
 0x23c   :  { %v572_v13 = vsel %vm571_vm3, %v570_v4, %v565_v7  ;;  %v646_v60 = vsub.s32 %v643_v47, %v1055_v51 }
 0x23d   :  { %v579_v17 = vsel %vm578_vm4, %v577_v15, %v572_v13  ;;  %v598_v31 = vrot.slane %v527_v22, %v597_v20 }
 0x23e   :  { %v1057_v52 = vpop.xlane.xlu0 %491  ;;  %v586_v27 = vsel %vm585_vm5, %v584_v19, %v579_v17 }
 0x23f   :  { %v593_v36 = vsel %vm592_vm6, %v591_v28, %v586_v27  ;;  %v530_v46 = vadd.f32 %v1062_v54, %v1057_v52 }
 0x240   :  { %v600_v41 = vsel %vm599_vm7, %v598_v31, %v593_v36 }
 0x241   :  { %v607_v50 = vsel %vm606_vm8, %v605_v45, %v600_v41  ;;  %v619_v59 = vrot.slane %v530_v46, %v618_v38 }
 0x242   :  { %v489_v56 = vpop.xlane.xlu0 %488 }
 0x243   :  { %v529_v33 = vadd.f32 %v1062_v54, %v489_v56  ;;  %v639_v56 = vsub.s32 %v636_v44, %v1055_v51 }
 0x245   :  { %v612_v42 = vrot.slane %v529_v33, %v611_v32 }
 0x246   :  { %v495_v0 = vpop.xlane.xlu0 %494 }
 0x247   :  { %v531_v43 = vadd.f32 %v1062_v54, %v495_v0  ;;  %v614_v26 = vsel %vm613_vm9, %v612_v42, %v607_v50  ;;  %v660_v0 = vsub.s32 %v657_v49, %v1055_v51 }
 0x248   :  { %v621_v1 = vsel %vm620_vm10, %v619_v59, %v614_v26 }
 0x249   :  { %v626_v55 = vrot.slane %v531_v43, %v625_v39 }
 0x24a   :  { %v504_v9 = vpop.xlane.xlu0 %503 }
 0x24b   :  { %v534_v61 = vadd.f32 %v1062_v54, %v504_v9  ;;  %v628_v4 = vsel %vm627_vm11, %v626_v55, %v621_v1 }
 0x24d   :  { %v647_v6 = vrot.slane %v534_v61, %v646_v60 }
 0x24e   :  { %v501_v24 = vpop.xlane.xlu0 %500 }
 0x24f   :  { %v533_v57 = vadd.f32 %v1062_v54, %v501_v24 }
 0x251   :  { %v640_v5 = vrot.slane %v533_v57, %v639_v56 }
 0x252   :  { %v507_v37 = vpop.xlane.xlu0 %506 }
 0x253   :  { %v535_v63 = vadd.f32 %v1062_v54, %v507_v37 }
 0x255   :  { %v654_v8 = vrot.slane %v535_v63, %v653_v62 }
 0x256   :  { %v510_v58 = vpop.xlane.xlu0 %509 }
 0x257   :  { %v536_v2 = vadd.f32 %v1062_v54, %v510_v58 }
 0x259   :  { %v661_v51 = vrot.slane %v536_v2, %v660_v0 }
 0x265   :  { %v498_v52 = vpop.xlane.xlu1 %497 }
 0x266   :  { %v532_v53 = vadd.f32 %v1062_v54, %v498_v52 }
 0x268   :  { %v633_v3 = vrot.slane %v532_v53, %v632_v21 }
 0x26a   :  { %v635_v7 = vsel %vm634_vm12, %v633_v3, %v628_v4 }
 0x26b   :  { %v642_v9 = vsel %vm641_vm13, %v640_v5, %v635_v7 }
 0x26c   :  { %v649_v10 = vsel %vm648_vm14, %v647_v6, %v642_v9 }
 0x26d   :  { %v656_v11 = vsel %vm655_vm15, %v654_v8, %v649_v10 }
 0x26e   :  { %v663_v12 = vsel %vm662_vm0, %v661_v51, %v656_v11 }
 0x26f   :  { %665 = vst [vmem:[#allocation3] sm:$0x1] %v663_v12 }
 0x270   :  { %836 = shalt.err (!%p833_p4)
}
 0x271   :  { %675 = dma.vmem_to_hbm [thread:$0]  %s673_s5, 16, %s1125_s7, [#allocation4]  }
 0x272   :  { %845 = dma.done.wait [#allocation4], 16  }
 0x273   :  { %846 = vsyncadd [#allocation4], 4294967280 }
 0x274   :  { %679 = vsyncpa [#allocation4], 1 }

</bundles_post_ra>
